<compile_context>
chip_gen: v7x
topology: tpu7x:2x2x1
jax: 0.10.0
libtpu: 0.0.40
codegen_flags: <defaults>
</compile_context>

<pallas_src>
import functools

import jax
import jax.numpy as jnp
from jax.experimental import pallas as pl
from jax.experimental.pallas import tpu as pltpu


def _round_up(x, m):
    return (x + m - 1) // m * m


def _linear_kernel(x_ref, w_ref, b_ref, o_ref):
    # x: (TM, K), w: (K, N) canonical MXU layout, b: (1, N), o: (TM, N)
    acc = jnp.dot(x_ref[...], w_ref[...], preferred_element_type=jnp.float32)
    o_ref[...] = (acc + b_ref[...]).astype(o_ref.dtype)


def prepare_params(weight, bias):
    """One-time param prep.

    weight: (num_classes, embed_dim) -> (embed_dim, num_classes)  [MXU-canonical]
    bias:   (num_classes,)           -> (1, num_classes)          [resident row]
    """
    # Optional further win: .astype(jnp.bfloat16) here (and on x upstream) to
    # halve weight/activation DMA bytes; f32 accumulation stays in the kernel.
    return jnp.asarray(weight).T, jnp.asarray(bias).reshape(1, -1)


def _choose_tm(m, block_m):
    """Pick the M tile size (rows per grid step)."""
    if m < 8:
        return m                      # full-extent block (legal at any size)
    if m > block_m:
        return block_m                # large M: block_m-row tiles, pipelined
    # m <= block_m: split into >= 2 sublane-aligned tiles so the "parallel"
    # grid axis shards across both v7x TensorCores instead of one big step.
    half = _round_up((m + 1) // 2, 8)
    return max(min(half, block_m), 8)


@functools.partial(jax.jit, static_argnames=("block_m", "use_pallas"))
def road_label_classifier(x, w_kn, b_1n, *, block_m=2048, use_pallas=None):
    """Pallas equivalent of nn.Linear(embed_dim, num_classes) applied to x.

    x:    (num_segments, embed_dim)  float32
    w_kn: (embed_dim, num_classes)   from prepare_params
    b_1n: (1, num_classes)           from prepare_params
    returns (num_segments, num_classes)
    """
    M, K = x.shape
    Kw, N = w_kn.shape
    assert Kw == K, "weight/input embed_dim mismatch"

    if use_pallas is None:
        # Tiny batches: a bare XLA matmul is the honest fast path (no Pallas
        # launch / DMA-pipeline overhead).
        use_pallas = M > 256
    if not use_pallas:
        return (x @ w_kn + b_1n).astype(x.dtype)

    tm = _choose_tm(M, block_m)
    grid = (pl.cdiv(M, tm),)

    itemsize = x.dtype.itemsize
    # Double-buffered x/out tiles + resident weight/bias (+ headroom).
    vmem_bytes = 2 * tm * (K + N) * itemsize
    vmem_bytes += 2 * (K * N + N) * w_kn.dtype.itemsize
    vmem_bytes = int(min(max(vmem_bytes + (2 << 20), 8 << 20), 32 << 20))

    cost = pl.CostEstimate(
        flops=2 * M * K * N,
        transcendentals=0,
        bytes_accessed=(M * K + K * N + N + M * N) * itemsize,
    )

    out = pl.pallas_call(
        _linear_kernel,
        out_shape=jax.ShapeDtypeStruct((M, N), x.dtype),
        grid=grid,
        in_specs=[
            pl.BlockSpec((tm, K), lambda i: (i, 0)),   # x tile marches over M
            pl.BlockSpec((K, N), lambda i: (0, 0)),    # weight resident in VMEM
            pl.BlockSpec((1, N), lambda i: (0, 0)),    # bias resident in VMEM
        ],
        out_specs=pl.BlockSpec((tm, N), lambda i: (i, 0)),  # unpadded N store
        compiler_params=pltpu.CompilerParams(
            dimension_semantics=("parallel",),  # shard M tiles across TCs (v7x)
            vmem_limit_bytes=vmem_bytes,
        ),
        cost_estimate=cost,
    )(x, w_kn, b_1n)
    return out


def init_linear_params(key, embed_dim, num_classes):
    # Deterministic init mimicking nn.Linear defaults: U(-1/sqrt(fan_in), 1/sqrt(fan_in))
    kw, kb = jax.random.split(key)
    bound = 1.0 / jnp.sqrt(jnp.float32(embed_dim))
    weight = jax.random.uniform(
        kw, (num_classes, embed_dim), jnp.float32, minval=-bound, maxval=bound
    )
    bias = jax.random.uniform(
        kb, (num_classes,), jnp.float32, minval=-bound, maxval=bound
    )
    return weight, bias


if __name__ == "__main__":
    key = jax.random.PRNGKey(0)
    k_x1, k_x2, k_x3, k_p = jax.random.split(key, 4)

    embed_dim, num_classes = 32, 16
    weight, bias = init_linear_params(k_p, embed_dim, num_classes)
    w_kn, b_1n = prepare_params(weight, bias)

    def ref_fn(xx):
        return xx @ weight.T + bias

    # 1) Multi-step "parallel" Pallas grid (M divisible by the tile).
    x1 = jax.random.normal(k_x1, (512, embed_dim), jnp.float32)
    o1 = jax.block_until_ready(
        road_label_classifier(x1, w_kn, b_1n, block_m=128, use_pallas=True)
    )
    assert o1.shape == (512, num_classes)
    assert jnp.allclose(o1, ref_fn(x1), atol=1e-5, rtol=1e-5)

    # 2) Ragged M (not a multiple of 8 or of the tile): Pallas masks the
    #    partial last block, no wrapper-side padding.
    x2 = jax.random.normal(k_x2, (300, embed_dim), jnp.float32)
    o2 = jax.block_until_ready(
        road_label_classifier(x2, w_kn, b_1n, use_pallas=True)
    )
    assert o2.shape == (300, num_classes)
    assert jnp.allclose(o2, ref_fn(x2), atol=1e-5, rtol=1e-5)

    # 3) Tiny-M path: wrapper auto-dispatches plain XLA (no Pallas launch cost).
    x3 = jax.random.normal(k_x3, (8, embed_dim), jnp.float32)
    o3 = jax.block_until_ready(road_label_classifier(x3, w_kn, b_1n))
    assert o3.shape == (8, num_classes)
    assert jnp.allclose(o3, ref_fn(x3), atol=1e-5, rtol=1e-5)

    print("KERNEL_OK")
</pallas_src>

<mosaic_0001>
module attributes {stable_mosaic.version = 11 : i64} {
  func.func @_linear_kernel(%arg0: i32, %arg1: memref<128x32xf32, #tpu.memory_space<vmem>>, %arg2: memref<32x16xf32, #tpu.memory_space<vmem>>, %arg3: memref<1x16xf32, #tpu.memory_space<vmem>>, %arg4: memref<128x16xf32, #tpu.memory_space<vmem>>) attributes {dimension_semantics = [#tpu.dimension_semantics<parallel>], iteration_bounds = array<i64: 4>, scalar_prefetch = 0 : i64, scratch_operands = 0 : i64, tpu.core_type = #tpu.core_type<tc>, window_params = [{transform_indices = @transform_0, window_bounds = array<i64: 128, 32>}, {pipeline_mode = #tpu.pipeline_mode<synchronous>, transform_indices = @transform_1, window_bounds = array<i64: 32, 16>}, {pipeline_mode = #tpu.pipeline_mode<synchronous>, transform_indices = @transform_2, window_bounds = array<i64: 1, 16>}, {transform_indices = @transform_3, window_bounds = array<i64: 128, 16>}]} {
    %c0 = arith.constant 0 : index
    %c0_0 = arith.constant 0 : index
    %0 = vector.load %arg1[%c0, %c0_0] : memref<128x32xf32, #tpu.memory_space<vmem>>, vector<128x32xf32>
    %c0_1 = arith.constant 0 : index
    %c0_2 = arith.constant 0 : index
    %1 = vector.load %arg2[%c0_1, %c0_2] : memref<32x16xf32, #tpu.memory_space<vmem>>, vector<32x16xf32>
    %cst = arith.constant dense<0.000000e+00> : vector<128x16xf32>
    %2 = tpu.matmul %0, %1, %cst {dimension_numbers = #tpu.dot_dimension_numbers<[1], [0], [0], [1], [0, 0, 1, 1], [], []>} : vector<128x32xf32>, vector<32x16xf32>, vector<128x16xf32> -> vector<128x16xf32>
    %c0_3 = arith.constant 0 : index
    %c0_4 = arith.constant 0 : index
    %3 = vector.load %arg3[%c0_3, %c0_4] : memref<1x16xf32, #tpu.memory_space<vmem>>, vector<1x16xf32>
    %4 = vector.broadcast %3 : vector<1x16xf32> to vector<128x16xf32>
    %5 = arith.addf %2, %4 : vector<128x16xf32>
    %c0_5 = arith.constant 0 : index
    %c0_6 = arith.constant 0 : index
    %6 = vector.load %arg4[%c0_5, %c0_6] : memref<128x16xf32, #tpu.memory_space<vmem>>, vector<128x16xf32>
    tpu.vector_store %arg4[%c0_5, %c0_6], %5 {strides = array<i32>} : memref<128x16xf32, #tpu.memory_space<vmem>>, vector<128x16xf32>,
    return
  }
  func.func @transform_0(%arg0: i32) -> (i32, i32) {
    %c0_i32 = arith.constant 0 : i32
    %c0_i32_0 = arith.constant 0 : i32
    return %arg0, %c0_i32 : i32, i32
  }
  func.func @transform_1(%arg0: i32) -> (i32, i32) {
    %c0_i32 = arith.constant 0 : i32
    %c0_i32_0 = arith.constant 0 : i32
    %c0_i32_1 = arith.constant 0 : i32
    return %c0_i32, %c0_i32_0 : i32, i32
  }
  func.func @transform_2(%arg0: i32) -> (i32, i32) {
    %c0_i32 = arith.constant 0 : i32
    %c0_i32_0 = arith.constant 0 : i32
    %c0_i32_1 = arith.constant 0 : i32
    return %c0_i32, %c0_i32_0 : i32, i32
  }
  func.func @transform_3(%arg0: i32) -> (i32, i32) {
    %c0_i32 = arith.constant 0 : i32
    %c0_i32_0 = arith.constant 0 : i32
    return %arg0, %c0_i32 : i32, i32
  }
}

</mosaic_0001>

<bundles_post_ra>
// kernel: road_label_classifier.1
= control target key start
LH: loop header
LB: loop body
LE: loop exit
PB: predicated region body
PF: predicated region fallthrough
CT: control target
= control target key end

     0   :  { %s596_s12 = smov 0   ;;  %s703_s0 = inlined_call_operand.vmem [shape: f32[512,32], index: 0, kind: input, shape index: {}]   ;;  %s704_s1 = inlined_call_operand.vmem [shape: f32[32,16], index: 1, kind: input, shape index: {}]   ;;  %s705_s2 = inlined_call_operand.vmem [shape: f32[1,16], index: 2, kind: input, shape index: {}]   ;;  %s706_s3 = inlined_call_operand.vmem [shape: f32[512,16], index: 3, kind: output, shape index: {}]  }
   0x1 LB: > { %s468_s13 = sadd.s32 4294967295, %s574_s12   ;;  %p472_p0 = scmp.ge.s32.totalorder %s574_s12, 1  ;;  %s574_s12 = sphi %s596_s12, %s13_s12  }
   0x2   : > { %p138_p1 = scmp.lt.s32.totalorder %s574_s12, 5 }
   0x4   : > { %p139_p2 = pnand %p472_p0, %p138_p1 }
   0x5   : > { %v190_v0 = vld [vmem:[%s704_s1] sm:$0xff] (!%p139_p2)  ;;  %v191_v1 = vld [vmem:[%s704_s1 + $0x8] sm:$0xff] (!%p139_p2)  ;;  %v192_v2 = vld [vmem:[%s704_s1 + $0x10] sm:$0xff] (!%p139_p2)  ;;  %s473_s20 = sshll.u32 (!%p139_p2), %s468_s13, 4  ;;  %vm201_vm0 = vcmask (!%p139_p2), 261120   ;;  %vm395_vm1 = vcmask (!%p139_p2), 130048  }
   0x6   : > { %142 = sbr.rel (%p139_p2) target bundleno = 247 (0xf7), region = 32  ;;  %v548_v3 = vpack.c.bf16 (!%p139_p2), %v191_v1, %v190_v0  ;;  %v193_v4 = vld [vmem:[%s704_s1 + $0x18] sm:$0xff] (!%p139_p2)  ;;  %p163_p3 = scmp.lt.s32.totalorder (!%p139_p2), %s473_s20, 63  ;;  %v477_v22 = vld [vmem:[%s705_s2] ss:$0 sm:$0xff] (!%p139_p2) }
   0x7   : > { %v552_v5 = vpack.c.bf16 (!%p139_p2), %v193_v4, %v192_v2 }
   0x8   : > { %549 = vmatprep.subr.bf16.mxu0 (!%p139_p2), %v548_v3  ;;  %556 = vmatprep.subr.bf16.mxu1 (!%p139_p2), %v548_v3 }
   0x9   : > { %551 = vmatpush3.bf16.msra.mxu0 (!%p139_p2), %v548_v3  ;;  %558 = vmatpush3.bf16.msra.mxu1 (!%p139_p2), %v548_v3 }
   0xa   : > { %553 = vmatprep.subr.bf16.mxu0 (!%p139_p2), %v552_v5  ;;  %557 = vmatprep.subr.bf16.mxu1 (!%p139_p2), %v552_v5 }
   0xd   : > { %s708_s20 = smov (!%p163_p3, %s473_s20), 63  ;;  %555 = vmatpush3.bf16.msra.mxu0 %v552_v5  ;;  %559 = vmatpush3.bf16.msra.mxu1 %v552_v5 }
   0xe   : > { %s474_s23 = sshll.u32 %s708_s20, 3 }
   0xf   : > { %s624_s26 = scalar_lea.vmem %s703_s0, %s474_s23  ;;  %s666_s4 = scalar_lea.vmem %s706_s3, %s474_s23 }
  0x10   : > { %v174_v6 = vld [vmem:[%s624_s26] sm:$0xff]  ;;  %v175_v8 = vld [vmem:[%s624_s26 + $0x8] sm:$0xff]  ;;  %v176_v10 = vld [vmem:[%s624_s26 + $0x10] sm:$0xff] }
  0x11   : > { %v182_v7 = vld [vmem:[%s624_s26 + $0x40] sm:$0xff]  ;;  %v183_v9 = vld [vmem:[%s624_s26 + $0x48] sm:$0xff]  ;;  %524 = vmatprep.mubr.msk.f32.mxu0 %vm201_vm0, %v174_v6  ;;  %v184_v11 = vld [vmem:[%s624_s26 + $0x50] sm:$0xff] }
  0x12   : > { %536 = vmatprep.mubr.msk.f32.mxu1 %vm201_vm0, %v182_v7  ;;  %525 = vmatmul.mubr.msk.f32.vlgmr.msra.gmra.mrb[0].mxu0 %vm201_vm0, %v175_v8  ;;  %v177_v12 = vld [vmem:[%s624_s26 + $0x18] sm:$0xff]  ;;  %v178_v14 = vld [vmem:[%s624_s26 + $0x20] sm:$0xff]  ;;  %v179_v16 = vld [vmem:[%s624_s26 + $0x28] sm:$0xff] }
  0x13   : > { %537 = vmatmul.mubr.msk.f32.vlgmr.msra.gmra.mrb[0].mxu1 %vm201_vm0, %v183_v9  ;;  %527 = vmatprep.mubr.msk.f32.mxu0 %vm201_vm0, %v176_v10  ;;  %v185_v13 = vld [vmem:[%s624_s26 + $0x58] sm:$0xff]  ;;  %v186_v15 = vld [vmem:[%s624_s26 + $0x60] sm:$0xff]  ;;  %v187_v17 = vld [vmem:[%s624_s26 + $0x68] sm:$0xff] }
  0x14   : > { %539 = vmatprep.mubr.msk.f32.mxu1 %vm201_vm0, %v184_v11  ;;  %v180_v18 = vld [vmem:[%s624_s26 + $0x30] sm:$0xff]  ;;  %v181_v20 = vld [vmem:[%s624_s26 + $0x38] sm:$0xff] }
  0x15   : > { %v188_v19 = vld [vmem:[%s624_s26 + $0x70] sm:$0xff]  ;;  %v189_v21 = vld [vmem:[%s624_s26 + $0x78] sm:$0xff] }
  0x16   : > { %528 = vmatmul.mubr.msk.f32.gmra.mrb[2].mxu0 %vm201_vm0, %v177_v12 }
  0x17   : > { %540 = vmatmul.mubr.msk.f32.gmra.mrb[2].mxu1 %vm201_vm0, %v185_v13  ;;  %530 = vmatprep.mubr.msk.f32.mxu0 %vm201_vm0, %v178_v14 }
  0x18   : > { %542 = vmatprep.mubr.msk.f32.mxu1 %vm201_vm0, %v186_v15 }
  0x1a   : > { %531 = vmatmul.mubr.msk.f32.gmra.mrb[4].mxu0 %vm201_vm0, %v179_v16 }
  0x1b   : > { %543 = vmatmul.mubr.msk.f32.gmra.mrb[4].mxu1 %vm201_vm0, %v187_v17  ;;  %533 = vmatprep.mubr.msk.f32.mxu0 %vm201_vm0, %v180_v18 }
  0x1c   : > { %545 = vmatprep.mubr.msk.f32.mxu1 %vm201_vm0, %v188_v19 }
  0x1e   : > { %534 = vmatmul.mubr.msk.f32.gmra.mrb[6].mxu0 %vm201_vm0, %v181_v20 }
  0x1f   : > { %546 = vmatmul.mubr.msk.f32.gmra.mrb[6].mxu1 %vm201_vm0, %v189_v21 }
  0xe5   : > { %v526_v23 = vpop.f32.mrb[0].mxu0 }
  0xe6   : > { %v538_v24 = vpop.f32.mrb[0].mxu1  ;;  %v322_v25 = vadd.f32 %v526_v23, %v477_v22  ;;  %v316_v27 = vpop.f32.mrb[1].mxu0 }
  0xe7   : > { %v362_v26 = vadd.f32 %v538_v24, %v477_v22  ;;  %v356_v28 = vpop.f32.mrb[1].mxu1  ;;  %v317_v29 = vadd.f32 %v477_v22, %v316_v27 }
  0xe8   : > { %v357_v30 = vadd.f32 %v477_v22, %v356_v28  ;;  %397 = vst.msk [vmem:[%s666_s4 + $0x8] sm:$0xff] %vm395_vm1, %v322_v25 }
  0xe9   : > { %405 = vst.msk [vmem:[%s666_s4 + $0x48] sm:$0xff] %vm395_vm1, %v362_v26  ;;  %396 = vst.msk [vmem:[%s666_s4] sm:$0xff] %vm395_vm1, %v317_v29  ;;  %v529_v31 = vpop.f32.mrb[2].mxu0 }
  0xea   : > { %404 = vst.msk [vmem:[%s666_s4 + $0x40] sm:$0xff] %vm395_vm1, %v357_v30  ;;  %v541_v32 = vpop.f32.mrb[2].mxu1  ;;  %v332_v33 = vadd.f32 %v529_v31, %v477_v22  ;;  %v326_v35 = vpop.f32.mrb[3].mxu0 }
  0xeb   : > { %v372_v34 = vadd.f32 %v541_v32, %v477_v22  ;;  %v366_v36 = vpop.f32.mrb[3].mxu1  ;;  %v327_v37 = vadd.f32 %v477_v22, %v326_v35 }
  0xec   : > { %v367_v38 = vadd.f32 %v477_v22, %v366_v36  ;;  %399 = vst.msk [vmem:[%s666_s4 + $0x18] sm:$0xff] %vm395_vm1, %v332_v33 }
  0xed   : > { %407 = vst.msk [vmem:[%s666_s4 + $0x58] sm:$0xff] %vm395_vm1, %v372_v34  ;;  %398 = vst.msk [vmem:[%s666_s4 + $0x10] sm:$0xff] %vm395_vm1, %v327_v37  ;;  %v532_v39 = vpop.f32.mrb[4].mxu0 }
  0xee   : > { %406 = vst.msk [vmem:[%s666_s4 + $0x50] sm:$0xff] %vm395_vm1, %v367_v38  ;;  %v544_v40 = vpop.f32.mrb[4].mxu1  ;;  %v342_v41 = vadd.f32 %v532_v39, %v477_v22  ;;  %v336_v43 = vpop.f32.mrb[5].mxu0 }
  0xef   : > { %v382_v42 = vadd.f32 %v544_v40, %v477_v22  ;;  %v376_v44 = vpop.f32.mrb[5].mxu1  ;;  %v337_v45 = vadd.f32 %v477_v22, %v336_v43 }
  0xf0   : > { %v377_v46 = vadd.f32 %v477_v22, %v376_v44  ;;  %401 = vst.msk [vmem:[%s666_s4 + $0x28] sm:$0xff] %vm395_vm1, %v342_v41 }
  0xf1   : > { %409 = vst.msk [vmem:[%s666_s4 + $0x68] sm:$0xff] %vm395_vm1, %v382_v42  ;;  %400 = vst.msk [vmem:[%s666_s4 + $0x20] sm:$0xff] %vm395_vm1, %v337_v45  ;;  %v535_v47 = vpop.f32.mrb[6].mxu0 }
  0xf2   : > { %408 = vst.msk [vmem:[%s666_s4 + $0x60] sm:$0xff] %vm395_vm1, %v377_v46  ;;  %v547_v48 = vpop.f32.mrb[6].mxu1  ;;  %v352_v49 = vadd.f32 %v535_v47, %v477_v22  ;;  %v346_v51 = vpop.f32.mrb[7].mxu0 }
  0xf3   : > { %v392_v50 = vadd.f32 %v547_v48, %v477_v22  ;;  %v386_v52 = vpop.f32.mrb[7].mxu1  ;;  %v347_v53 = vadd.f32 %v477_v22, %v346_v51 }
  0xf4   : > { %v387_v54 = vadd.f32 %v477_v22, %v386_v52  ;;  %403 = vst.msk [vmem:[%s666_s4 + $0x38] sm:$0xff] %vm395_vm1, %v352_v49 }
  0xf5   : > { %411 = vst.msk [vmem:[%s666_s4 + $0x78] sm:$0xff] %vm395_vm1, %v392_v50  ;;  %402 = vst.msk [vmem:[%s666_s4 + $0x30] sm:$0xff] %vm395_vm1, %v347_v53 }
  0xf6   : > { %410 = vst.msk [vmem:[%s666_s4 + $0x70] sm:$0xff] %vm395_vm1, %v387_v54 }
  0xf7 PF: > { %s13_s12 = sadd.s32 1, %s574_s12  }
  0xf8   : > { %p10_p4 = scmp.ge.s32.totalorder %s13_s12, 6  }
  0xfa   :  { %12 = sbr.rel (!%p10_p4) target bundleno = 1 (0x1), region = 62 }

</bundles_post_ra>
